<compile_context>
chip_gen: v5e
topology: v5e:2x2
jax: 0.10.0
libtpu: 0.0.40
codegen_flags: <defaults>
</compile_context>

<pallas_src>
import functools

import numpy as np
import jax
import jax.numpy as jnp
from jax.experimental import pallas as pl
from jax.experimental.pallas import tpu as pltpu


def _round_up(v, m):
    return ((v + m - 1) // m) * m


def _quantizer_kernel(x_ref, q_ref, sym_ref, *, midpoints, c0, delta):
    """midpoints: tuple of L-1 ascending Python floats (exact f32 midpoints of
    the linspace centers); c0, delta: Python floats.  All static constants.
    """
    x = x_ref[...]                                     # (TB, TF) f32

    # Hoisted broadcasts (JAX does not CSE broadcast_in_dim inside the loop).
    ones = jnp.ones_like(x)
    zeros = jnp.zeros_like(x)

    # Closed-form nearest-center index for equispaced centers:
    #   idx = #{ k : x > midpoint_k }
    # Strict '>' keeps the LOWER index at an exact midpoint, matching
    # torch.argmax's first-max tie-breaking on phi_hard.  Clamping to
    # [0, L-1] is implicit.
    idx_f = zeros
    for m in midpoints:
        idx_f = idx_f + jnp.where(x > m, ones, zeros)

    # Forward value of q: hardout == the selected center (see header note).
    q_ref[...] = c0 + idx_f * delta
    sym_ref[...] = idx_f.astype(jnp.int32)


def quantizer_forward(x, num_centers, *, tb=256, tile_bytes=2 * 1024 * 1024):
    """Forward pass of Quantizer(num_centers, num_features) for x of shape (B, F).

    Returns (q, symbols_hard) with dtypes (float32, int32).
    """
    B, F = x.shape

    # Deterministic parameter init, identical to torch.linspace(-1, 1, L).
    centers = np.linspace(-1.0, 1.0, num_centers).astype(np.float32)
    c0 = float(centers[0])
    if num_centers > 1:
        # Exact f32 midpoints of the f32 centers (computed in f64, rounded once)
        # so the kernel's decision boundaries match the reference's squared-
        # distance comparison.
        mids = tuple(
            float(np.float32((np.float64(centers[k]) + np.float64(centers[k + 1])) * 0.5))
            for k in range(num_centers - 1))
        delta = float(np.float32(
            (np.float64(centers[-1]) - np.float64(centers[0])) / (num_centers - 1)))
    else:
        mids = ()
        delta = 0.0

    # Tile selection: lane-dense, ~tile_bytes per f32 tile.  If B clamps tb
    # small, tf scales up to keep the tile large (amortizes the ~0.35us/step
    # overhead and keeps output stores unmasked full-lane vst).
    tb = min(tb, _round_up(B, 8))                      # multiple of 8
    target_tf = max(128, (tile_bytes // 4) // max(tb, 1))
    tf = min(_round_up(F, 128), _round_up(target_tf, 128))   # multiple of 128

    kernel = functools.partial(_quantizer_kernel, midpoints=mids, c0=c0, delta=delta)

    # No pad / no slice: pl.cdiv grid, Pallas masks the ragged edge blocks.
    grid = (pl.cdiv(B, tb), pl.cdiv(F, tf))
    q, sym = pl.pallas_call(
        kernel,
        out_shape=(
            jax.ShapeDtypeStruct((B, F), jnp.float32),   # q
            jax.ShapeDtypeStruct((B, F), jnp.int32),     # symbols_hard
        ),
        grid=grid,
        in_specs=[
            pl.BlockSpec((tb, tf), lambda i, j: (i, j)),   # x tile
        ],
        out_specs=(
            pl.BlockSpec((tb, tf), lambda i, j: (i, j)),
            pl.BlockSpec((tb, tf), lambda i, j: (i, j)),
        ),
        compiler_params=pltpu.CompilerParams(
            dimension_semantics=("parallel", "parallel")),
    )(x)
    return q, sym


def _reference(x, num_centers):
    """Pure-JAX reference mirroring the PyTorch forward exactly."""
    centers = jnp.asarray(np.linspace(-1.0, 1.0, num_centers).astype(np.float32))
    sigma = 2.0 / num_centers
    dist = jnp.square(x[:, None, :] - centers[None, :, None])       # (B, L, F)
    phi_soft = jax.nn.softmax(-sigma * dist, axis=1)
    phi_hard = jax.nn.softmax(-10000000.0 * dist, axis=1)
    softout = jnp.sum(phi_soft * centers[None, :, None], axis=1)
    hardout = jnp.sum(phi_hard * centers[None, :, None], axis=1)
    q_ref = (softout + hardout) - softout
    sym_ref = jnp.argmax(phi_hard, axis=1).astype(jnp.int32)
    return q_ref, sym_ref


if __name__ == "__main__":
    L = 8                                   # num_centers

    # case 1: aligned small shape (batch=8, num_features=256), single block
    B, F = 8, 256
    x = jax.random.uniform(jax.random.PRNGKey(0), (B, F), dtype=jnp.float32,
                           minval=-1.2, maxval=1.2)
    q, sym = quantizer_forward(x, L)
    jax.block_until_ready((q, sym))
    q_ref, sym_ref = _reference(x, L)
    assert q.shape == (B, F) and q.dtype == jnp.float32
    assert sym.shape == (B, F) and sym.dtype == jnp.int32
    assert jnp.allclose(q, q_ref, atol=1e-5), "q mismatch vs reference"
    assert jnp.array_equal(sym, sym_ref), "symbols_hard mismatch vs reference"

    # case 2: ragged shape, exercises the no-pad / masked edge-block path
    B2, F2 = 6, 200
    x2 = jax.random.uniform(jax.random.PRNGKey(1), (B2, F2), dtype=jnp.float32,
                            minval=-1.2, maxval=1.2)
    q2, sym2 = quantizer_forward(x2, L)
    jax.block_until_ready((q2, sym2))
    q2_ref, sym2_ref = _reference(x2, L)
    assert q2.shape == (B2, F2) and sym2.shape == (B2, F2)
    assert jnp.allclose(q2, q2_ref, atol=1e-5), "q mismatch (ragged) vs reference"
    assert jnp.array_equal(sym2, sym2_ref), "symbols_hard mismatch (ragged) vs reference"

    # case 3: multi-block ragged grid (forced small tiles), out-of-range inputs
    B3, F3 = 20, 320
    x3 = jax.random.uniform(jax.random.PRNGKey(2), (B3, F3), dtype=jnp.float32,
                            minval=-1.5, maxval=1.5)
    q3, sym3 = quantizer_forward(x3, L, tb=8, tile_bytes=8 * 128 * 4)
    jax.block_until_ready((q3, sym3))
    q3_ref, sym3_ref = _reference(x3, L)
    assert jnp.allclose(q3, q3_ref, atol=1e-5), "q mismatch (multi-block) vs reference"
    assert jnp.array_equal(sym3, sym3_ref), "symbols_hard mismatch (multi-block) vs reference"

    print("KERNEL_OK")
</pallas_src>

<mosaic_0001>
module attributes {stable_mosaic.version = 11 : i64} {
  func.func @_quantizer_kernel(%arg0: i32, %arg1: i32, %arg2: memref<8x256xf32, #tpu.memory_space<vmem>>, %arg3: memref<8x256xf32, #tpu.memory_space<vmem>>, %arg4: memref<8x256xi32, #tpu.memory_space<vmem>>) attributes {dimension_semantics = [#tpu.dimension_semantics<parallel>, #tpu.dimension_semantics<parallel>], iteration_bounds = array<i64: 1, 1>, scalar_prefetch = 0 : i64, scratch_operands = 0 : i64, tpu.core_type = #tpu.core_type<tc>, window_params = [{transform_indices = @transform_0, window_bounds = array<i64: 8, 256>}, {transform_indices = @transform_1, window_bounds = array<i64: 8, 256>}, {transform_indices = @transform_2, window_bounds = array<i64: 8, 256>}]} {
    %c0 = arith.constant 0 : index
    %c0_0 = arith.constant 0 : index
    %0 = vector.load %arg2[%c0, %c0_0] : memref<8x256xf32, #tpu.memory_space<vmem>>, vector<8x256xf32>
    %cst = arith.constant 1.000000e+00 : f32
    %1 = vector.broadcast %cst : f32 to vector<8x256xf32>
    %cst_1 = arith.constant 0.000000e+00 : f32
    %2 = vector.broadcast %cst_1 : f32 to vector<8x256xf32>
    %cst_2 = arith.constant -0.857142865 : f32
    %3 = vector.broadcast %cst_2 : f32 to vector<8x256xf32>
    %4 = arith.cmpf ogt, %0, %3 : vector<8x256xf32>
    %5 = arith.select %4, %1, %2 : vector<8x256xi1>, vector<8x256xf32>
    %6 = arith.addf %2, %5 : vector<8x256xf32>
    %cst_3 = arith.constant -0.571428597 : f32
    %7 = vector.broadcast %cst_3 : f32 to vector<8x256xf32>
    %8 = arith.cmpf ogt, %0, %7 : vector<8x256xf32>
    %9 = arith.select %8, %1, %2 : vector<8x256xi1>, vector<8x256xf32>
    %10 = arith.addf %6, %9 : vector<8x256xf32>
    %cst_4 = arith.constant -0.285714298 : f32
    %11 = vector.broadcast %cst_4 : f32 to vector<8x256xf32>
    %12 = arith.cmpf ogt, %0, %11 : vector<8x256xf32>
    %13 = arith.select %12, %1, %2 : vector<8x256xi1>, vector<8x256xf32>
    %14 = arith.addf %10, %13 : vector<8x256xf32>
    %cst_5 = arith.constant 0.000000e+00 : f32
    %15 = vector.broadcast %cst_5 : f32 to vector<8x256xf32>
    %16 = arith.cmpf ogt, %0, %15 : vector<8x256xf32>
    %17 = arith.select %16, %1, %2 : vector<8x256xi1>, vector<8x256xf32>
    %18 = arith.addf %14, %17 : vector<8x256xf32>
    %cst_6 = arith.constant 0.285714298 : f32
    %19 = vector.broadcast %cst_6 : f32 to vector<8x256xf32>
    %20 = arith.cmpf ogt, %0, %19 : vector<8x256xf32>
    %21 = arith.select %20, %1, %2 : vector<8x256xi1>, vector<8x256xf32>
    %22 = arith.addf %18, %21 : vector<8x256xf32>
    %cst_7 = arith.constant 0.571428597 : f32
    %23 = vector.broadcast %cst_7 : f32 to vector<8x256xf32>
    %24 = arith.cmpf ogt, %0, %23 : vector<8x256xf32>
    %25 = arith.select %24, %1, %2 : vector<8x256xi1>, vector<8x256xf32>
    %26 = arith.addf %22, %25 : vector<8x256xf32>
    %cst_8 = arith.constant 0.857142865 : f32
    %27 = vector.broadcast %cst_8 : f32 to vector<8x256xf32>
    %28 = arith.cmpf ogt, %0, %27 : vector<8x256xf32>
    %29 = arith.select %28, %1, %2 : vector<8x256xi1>, vector<8x256xf32>
    %30 = arith.addf %26, %29 : vector<8x256xf32>
    %cst_9 = arith.constant 0.285714298 : f32
    %31 = vector.broadcast %cst_9 : f32 to vector<8x256xf32>
    %32 = arith.mulf %30, %31 : vector<8x256xf32>
    %cst_10 = arith.constant -1.000000e+00 : f32
    %33 = vector.broadcast %cst_10 : f32 to vector<8x256xf32>
    %34 = arith.addf %33, %32 : vector<8x256xf32>
    %c0_11 = arith.constant 0 : index
    %c0_12 = arith.constant 0 : index
    %35 = vector.load %arg3[%c0_11, %c0_12] : memref<8x256xf32, #tpu.memory_space<vmem>>, vector<8x256xf32>
    tpu.vector_store %arg3[%c0_11, %c0_12], %34 {strides = array<i32>} : memref<8x256xf32, #tpu.memory_space<vmem>>, vector<8x256xf32>,
    %36 = arith.fptosi %30 : vector<8x256xf32> to vector<8x256xi32>
    %c0_13 = arith.constant 0 : index
    %c0_14 = arith.constant 0 : index
    %37 = vector.load %arg4[%c0_13, %c0_14] : memref<8x256xi32, #tpu.memory_space<vmem>>, vector<8x256xi32>
    tpu.vector_store %arg4[%c0_13, %c0_14], %36 {strides = array<i32>} : memref<8x256xi32, #tpu.memory_space<vmem>>, vector<8x256xi32>,
    return
  }
  func.func @transform_0(%arg0: i32, %arg1: i32) -> (i32, i32) {
    %c0_i32 = arith.constant 0 : i32
    return %arg0, %arg1 : i32, i32
  }
  func.func @transform_1(%arg0: i32, %arg1: i32) -> (i32, i32) {
    %c0_i32 = arith.constant 0 : i32
    return %arg0, %arg1 : i32, i32
  }
  func.func @transform_2(%arg0: i32, %arg1: i32) -> (i32, i32) {
    %c0_i32 = arith.constant 0 : i32
    return %arg0, %arg1 : i32, i32
  }
}

</mosaic_0001>

<bundles_post_ra>
// kernel: tpu_custom_call.1
= control target key start
LH: loop header
LB: loop body
LE: loop exit
PB: predicated region body
PF: predicated region fallthrough
CT: control target
= control target key end

     0   :  { %8 = vsyncpa [#allocation3], 0  ;;  %s233_s0 = inlined_call_operand.hbm [shape: f32[8,256], index: 0, kind: input, shape index: {}]   ;;  %s234_s1 = inlined_call_operand.hbm [shape: f32[8,256], index: 1, kind: output, shape index: {0}]   ;;  %s235_s2 = inlined_call_operand.hbm [shape: s32[8,256], index: 2, kind: output, shape index: {1}]  }
   0x1   :  { %9 = vsyncpa [#allocation4], 0 }
   0x2   :  { %10 = vsyncpa [#allocation7], 0  ;;  %s16_s11 = sshll.u32 %s233_s0, 4  ;;  %s205_s12 = smov [#allocation2]   ;;  %s17_s11 = int_to_ptr.hbm [resolvable:$true] %s16_s11 }
   0x3   :  { %s18_s13 = sshll.u32 %s205_s12, 4  ;;  %s19_s13 = int_to_ptr.vmem [resolvable:$true] %s18_s13 }
   0x4   :  { %21 = dma.hbm_to_vmem [thread:$0]  %s17_s11, 256, %s19_s13, [#allocation3]  }
   0x5   :  { %199 = dma.done.wait [#allocation3], 256  }
   0x6   :  { %200 = vsyncadd [#allocation3], 4294967040  ;;  %v26_v0 = vld [vmem:[#allocation2] sm:$0xff]  ;;  %v27_v1 = vld [vmem:[#allocation2 + $0x8] sm:$0xff]  ;;  %v206_v2 = vmov 0.0   ;;  %s207_s0 = smov [#allocation5]  }
   0x7   :  { %vm28_vm0 = vcmp.gt.f32.partialorder %v26_v0, -0.85714287  ;;  %vm34_vm1 = vcmp.gt.f32.partialorder %v26_v0, -0.5714286  ;;  %vm40_vm2 = vcmp.gt.f32.partialorder %v26_v0, -0.2857143 }
   0x8   :  { %v30_v3 = vsel %vm28_vm0, 1.0, %v206_v2  ;;  %v36_v4 = vsel %vm34_vm1, 1.0, %v206_v2  ;;  %v42_v5 = vsel %vm40_vm2, 1.0, %v206_v2  ;;  %vm46_vm3 = vcmp.gt.f32.partialorder %v26_v0, 0.0  ;;  %s85_s14 = sshll.u32 %s207_s0, 4  ;;  %s87_s17 = sshll.u32 %s234_s1, 4  ;;  %s86_s14 = int_to_ptr.vmem [resolvable:$true] %s85_s14  ;;  %s88_s17 = int_to_ptr.hbm [resolvable:$true] %s87_s17 }
   0x9   :  { %v38_v6 = vadd.f32 %v36_v4, %v30_v3  ;;  %vm52_vm4 = vcmp.gt.f32.partialorder %v26_v0, 0.2857143  ;;  %v48_v7 = vsel %vm46_vm3, 1.0, %v206_v2  ;;  %vm58_vm5 = vcmp.gt.f32.partialorder %v26_v0, 0.5714286  ;;  %s208_s18 = smov [#allocation6]  }
   0xa   :  { %vm29_vm6 = vcmp.gt.f32.partialorder %v27_v1, -0.85714287  ;;  %v54_v9 = vsel %vm52_vm4, 1.0, %v206_v2  ;;  %vm35_vm7 = vcmp.gt.f32.partialorder %v27_v1, -0.5714286  ;;  %vm47_vm10 = vcmp.gt.f32.partialorder %v27_v1, 0.0 }
   0xb   :  { %v44_v8 = vadd.f32 %v42_v5, %v38_v6  ;;  %v31_v10 = vsel %vm29_vm6, 1.0, %v206_v2  ;;  %vm64_vm8 = vcmp.gt.f32.partialorder %v26_v0, 0.85714287  ;;  %v37_v11 = vsel %vm35_vm7, 1.0, %v206_v2  ;;  %s96_s19 = sshll.u32 %s208_s18, 4  ;;  %s98_s22 = sshll.u32 %s235_s2, 4  ;;  %s97_s19 = int_to_ptr.vmem [resolvable:$true] %s96_s19  ;;  %s99_s22 = int_to_ptr.hbm [resolvable:$true] %s98_s22 }
   0xc   :  { %vm41_vm9 = vcmp.gt.f32.partialorder %v27_v1, -0.2857143  ;;  %v39_v13 = vadd.f32 %v37_v11, %v31_v10  ;;  %vm53_vm11 = vcmp.gt.f32.partialorder %v27_v1, 0.2857143  ;;  %v60_v15 = vsel %vm58_vm5, 1.0, %v206_v2 }
   0xd   :  { %v50_v12 = vadd.f32 %v48_v7, %v44_v8  ;;  %v43_v14 = vsel %vm41_vm9, 1.0, %v206_v2  ;;  %v49_v16 = vsel %vm47_vm10, 1.0, %v206_v2  ;;  %vm59_vm12 = vcmp.gt.f32.partialorder %v27_v1, 0.5714286 }
   0xe   :  { %v45_v18 = vadd.f32 %v43_v14, %v39_v13  ;;  %v66_v19 = vsel %vm64_vm8, 1.0, %v206_v2  ;;  %v55_v20 = vsel %vm53_vm11, 1.0, %v206_v2  ;;  %vm65_vm13 = vcmp.gt.f32.partialorder %v27_v1, 0.85714287 }
   0xf   :  { %v56_v17 = vadd.f32 %v54_v9, %v50_v12  ;;  %v61_v23 = vsel %vm59_vm12, 1.0, %v206_v2  ;;  %v67_v26 = vsel %vm65_vm13, 1.0, %v206_v2 }
  0x10   :  { %v51_v22 = vadd.f32 %v49_v16, %v45_v18 }
  0x11   :  { %v62_v21 = vadd.f32 %v60_v15, %v56_v17 }
  0x12   :  { %v57_v25 = vadd.f32 %v55_v20, %v51_v22 }
  0x13   :  { %v68_v24 = vadd.f32 %v66_v19, %v62_v21 }
  0x14   :  { %v63_v28 = vadd.f32 %v61_v23, %v57_v25 }
  0x15   :  { %v70_v27 = vmul.f32 0.2857143, %v68_v24  ;;  %vm113_vm14 = vcmp.lt.s32.totalorder %v68_v24, 0  ;;  %v114_v29 = vceil.f32 %v68_v24  ;;  %v115_v30 = vfloor.f32 %v68_v24 }
  0x16   :  { %v69_v32 = vadd.f32 %v67_v26, %v63_v28 }
  0x17   :  { %v72_v31 = vadd.f32 -1.0, %v70_v27  ;;  %v116_v33 = vsel %vm113_vm14, %v114_v29, %v115_v30 }
  0x18   :  { %v71_v34 = vmul.f32 0.2857143, %v69_v32  ;;  %v117_v35 = vcvt.f32.s32 %v116_v33  ;;  %vm118_vm15 = vcmp.lt.s32.totalorder %v69_v32, 0  ;;  %v119_v36 = vceil.f32 %v69_v32 }
  0x19   :  { %74 = vst [vmem:[#allocation5] sm:$0xff] %v72_v31  ;;  %v120_v37 = vfloor.f32 %v69_v32 }
  0x1a   :  { %v73_v38 = vadd.f32 -1.0, %v71_v34  ;;  %78 = vst [vmem:[#allocation6] sm:$0xff] %v117_v35 }
  0x1b   :  { %v121_v39 = vsel %vm118_vm15, %v119_v36, %v120_v37 }
  0x1c   :  { %75 = vst [vmem:[#allocation5 + $0x8] sm:$0xff] %v73_v38  ;;  %v122_v40 = vcvt.f32.s32 %v121_v39 }
  0x1d   :  { %90 = dma.vmem_to_hbm [thread:$0]  %s86_s14, 256, %s88_s17, [#allocation4]  }
  0x1e   :  { %79 = vst [vmem:[#allocation6 + $0x8] sm:$0xff] %v122_v40 }
  0x1f   :  { %101 = dma.vmem_to_hbm [thread:$0]  %s97_s19, 256, %s99_s22, [#allocation7]  }
  0x20   :  { %201 = dma.done.wait [#allocation4], 256  }
  0x21   :  { %202 = vsyncadd [#allocation4], 4294967040 }
  0x22   :  { %203 = dma.done.wait [#allocation7], 256  }
  0x23   :  { %204 = vsyncadd [#allocation7], 4294967040 }
  0x24   :  { %110 = vsyncpa [#allocation3], 1 }
  0x25   :  { %111 = vsyncpa [#allocation4], 1 }
  0x26   :  { %112 = vsyncpa [#allocation7], 1 }

</bundles_post_ra>
